<compile_context>
chip_gen: v7x
topology: tpu7x:2x2x1
jax: 0.10.0
libtpu: 0.0.40
codegen_flags: <defaults>
</compile_context>

<pallas_src>
import jax
import jax.numpy as jnp
from jax.experimental import pallas as pl
from jax.experimental.pallas import tpu as pltpu


def _round_up(a: int, m: int) -> int:
    return ((a + m - 1) // m) * m


def residual_block_kernel(x_ref, w_ref, b_ref, o_ref):
    x = x_ref[...]                                   # (tile_n, dim_p), input dtype
    w = w_ref[...]                                   # (dim_p, dim_p), pre-transposed (in, out)
    b = b_ref[...]                                   # (1, dim_p), f32

    # MXU matmul; x is cast to the weight's compute dtype, accumulation is f32.
    y = jnp.dot(x.astype(w.dtype), w, preferred_element_type=jnp.float32)
    # f32 epilogue on the VPU: bias + ReLU + residual add.
    y = jnp.maximum(y + b, 0.0)
    o_ref[...] = (y + x.astype(jnp.float32)).astype(o_ref.dtype)


def residual_block(x, w, b, *, compute_dtype=None, tile_n=None):
    """out = relu(x @ w.T + b) + x.

    x: (..., dim); w: (dim, dim) in PyTorch (out_features, in_features) layout; b: (dim,).
    compute_dtype: optional dtype for the matmul operands (e.g. jnp.bfloat16).
    """
    orig_shape = x.shape
    dim = orig_shape[-1]
    assert w.shape == (dim, dim) and b.shape == (dim,)

    # Flatten leading batch dims (nn.Linear accepts (..., dim)).
    x2 = x.reshape(-1, dim)
    N = x2.shape[0]
    out_dtype = x.dtype

    # One-time layout plumbing in XLA: transpose weight to (in, out) so the
    # kernel does jnp.dot(x, w) with no in-kernel transpose.
    wt = jnp.transpose(w)
    if compute_dtype is not None:
        wt = wt.astype(compute_dtype)

    # Lane-dense / sublane-aligned padding.
    dim_p = _round_up(dim, 128)
    n_p8 = _round_up(N, 8)

    itemsize_x = jnp.dtype(x.dtype).itemsize
    itemsize_w = jnp.dtype(wt.dtype).itemsize
    itemsize_o = jnp.dtype(out_dtype).itemsize

    # VMEM-aware tile selection (generation-aware via get_tpu_info).
    try:
        vmem_cap = int(getattr(pltpu.get_tpu_info(), "vmem_capacity_bytes",
                               64 * 1024 * 1024))
    except Exception:
        vmem_cap = 64 * 1024 * 1024                  # conservative v7x assumption

    w_bytes = 2 * dim_p * dim_p * itemsize_w         # (worst case double-buffered) weight
    b_bytes = 2 * dim_p * 4
    per_row = 2 * dim_p * (itemsize_x + itemsize_o)  # double-buffered x tile + out tile

    if tile_n is None:
        budget = vmem_cap // 8                       # safely within default scoped VMEM
        avail = max(budget - w_bytes - b_bytes, 8 * per_row)
        tile_n = int(avail // per_row)
        tile_n = max(8, min(1024, (tile_n // 8) * 8))
        # Cap so the grid has >= 2 parallel steps when rows allow (v7x: 2 TCs).
        half = _round_up(pl.cdiv(n_p8, 2), 8)
        tile_n = min(tile_n, half)
    tile_n = max(8, _round_up(tile_n, 8))

    n_p = _round_up(n_p8, tile_n)
    grid = (n_p // tile_n,)

    # Zero padding is inert: padded weight rows/cols and bias entries are 0, so
    # padded output features are relu(0) + 0 = 0; padded rows are sliced off.
    xp = x2 if (n_p == N and dim_p == dim) else jnp.pad(
        x2, ((0, n_p - N), (0, dim_p - dim)))
    wtp = wt if dim_p == dim else jnp.pad(
        wt, ((0, dim_p - dim), (0, dim_p - dim)))
    bp = jnp.pad(b.astype(jnp.float32), (0, dim_p - dim)).reshape(1, dim_p)

    # Scoped-VMEM hint: enough for tiles + weight (with headroom), capped to chip.
    need = 2 * tile_n * dim_p * (itemsize_x + itemsize_o) + w_bytes + b_bytes
    vmem_limit = min(max(2 * need, 32 * 1024 * 1024),
                     max(32 * 1024 * 1024, int(0.7 * vmem_cap)))

    cost = pl.CostEstimate(
        flops=2 * n_p * dim_p * dim_p,
        transcendentals=0,
        bytes_accessed=(n_p * dim_p * itemsize_x + dim_p * dim_p * itemsize_w
                        + dim_p * 4 + n_p * dim_p * itemsize_o),
    )

    out_p = pl.pallas_call(
        residual_block_kernel,
        out_shape=jax.ShapeDtypeStruct((n_p, dim_p), out_dtype),
        grid_spec=pltpu.PrefetchScalarGridSpec(
            num_scalar_prefetch=0,
            grid=grid,
            in_specs=[
                pl.BlockSpec((tile_n, dim_p), lambda i: (i, 0)),   # x row tile
                pl.BlockSpec((dim_p, dim_p), lambda i: (0, 0)),    # full weight (constant block)
                pl.BlockSpec((1, dim_p), lambda i: (0, 0)),        # bias (constant block)
            ],
            out_specs=pl.BlockSpec((tile_n, dim_p), lambda i: (i, 0)),
        ),
        compiler_params=pltpu.CompilerParams(
            dimension_semantics=("parallel",),
            vmem_limit_bytes=vmem_limit,
        ),
        cost_estimate=cost,
    )(xp, wtp, bp)

    out = out_p[:N, :dim]
    return out.reshape(orig_shape)


if __name__ == "__main__":
    key = jax.random.PRNGKey(0)
    k_x, k_w, k_b = jax.random.split(key, 3)

    N, dim = 16, 32   # small test shape; wrapper pads to lane/sublane-aligned tiles

    # Deterministic synthetic parameters (mimic nn.Linear's uniform(-1/sqrt(dim), 1/sqrt(dim)))
    bound = 1.0 / jnp.sqrt(jnp.float32(dim))
    w = jax.random.uniform(k_w, (dim, dim), jnp.float32, minval=-bound, maxval=bound)
    b = jax.random.uniform(k_b, (dim,), jnp.float32, minval=-bound, maxval=bound)
    x = jax.random.normal(k_x, (N, dim), jnp.float32)

    ref = jnp.maximum(x @ w.T + b, 0.0) + x

    # f32 path
    out = jax.block_until_ready(residual_block(x, w, b))
    assert out.shape == (N, dim)
    assert jnp.allclose(out, ref, atol=1e-5, rtol=1e-5), "f32 mismatch vs reference"

    # bf16 compute path (f32 accumulation + f32 epilogue), looser tolerance
    out_bf16 = jax.block_until_ready(
        residual_block(x, w, b, compute_dtype=jnp.bfloat16))
    assert out_bf16.shape == (N, dim)
    assert jnp.allclose(out_bf16, ref, atol=5e-2, rtol=5e-2), "bf16 mismatch vs reference"

    # Leading-batch-dims path (nn.Linear accepts (..., dim))
    x3 = x.reshape(2, 8, dim)
    out3 = jax.block_until_ready(residual_block(x3, w, b))
    assert out3.shape == (2, 8, dim)
    assert jnp.allclose(out3.reshape(N, dim), ref, atol=1e-5, rtol=1e-5), "batched mismatch"

    print("KERNEL_OK")
</pallas_src>

<mosaic_0001>
module attributes {stable_mosaic.version = 11 : i64} {
  func.func @residual_block_kernel(%arg0: i32, %arg1: memref<8x128xf32, #tpu.memory_space<vmem>>, %arg2: memref<128x128xf32, #tpu.memory_space<vmem>>, %arg3: memref<1x128xf32, #tpu.memory_space<vmem>>, %arg4: memref<8x128xf32, #tpu.memory_space<vmem>>) attributes {dimension_semantics = [#tpu.dimension_semantics<parallel>], iteration_bounds = array<i64: 2>, scalar_prefetch = 0 : i64, scratch_operands = 0 : i64, tpu.core_type = #tpu.core_type<tc>, window_params = [{transform_indices = @transform_0, window_bounds = array<i64: 8, 128>}, {pipeline_mode = #tpu.pipeline_mode<synchronous>, transform_indices = @transform_1, window_bounds = array<i64: 128, 128>}, {pipeline_mode = #tpu.pipeline_mode<synchronous>, transform_indices = @transform_2, window_bounds = array<i64: 1, 128>}, {transform_indices = @transform_3, window_bounds = array<i64: 8, 128>}]} {
    %c0 = arith.constant 0 : index
    %c0_0 = arith.constant 0 : index
    %0 = vector.load %arg1[%c0, %c0_0] : memref<8x128xf32, #tpu.memory_space<vmem>>, vector<8x128xf32>
    %c0_1 = arith.constant 0 : index
    %c0_2 = arith.constant 0 : index
    %1 = vector.load %arg2[%c0_1, %c0_2] : memref<128x128xf32, #tpu.memory_space<vmem>>, vector<128x128xf32>
    %c0_3 = arith.constant 0 : index
    %c0_4 = arith.constant 0 : index
    %2 = vector.load %arg3[%c0_3, %c0_4] : memref<1x128xf32, #tpu.memory_space<vmem>>, vector<1x128xf32>
    %cst = arith.constant dense<0.000000e+00> : vector<8x128xf32>
    %3 = tpu.matmul %0, %1, %cst {dimension_numbers = #tpu.dot_dimension_numbers<[1], [0], [0], [1], [0, 0, 1, 1], [], []>} : vector<8x128xf32>, vector<128x128xf32>, vector<8x128xf32> -> vector<8x128xf32>
    %4 = vector.broadcast %2 : vector<1x128xf32> to vector<8x128xf32>
    %5 = arith.addf %3, %4 : vector<8x128xf32>
    %cst_5 = arith.constant 0.000000e+00 : f32
    %6 = vector.broadcast %cst_5 : f32 to vector<8x128xf32>
    %7 = arith.maximumf %5, %6 : vector<8x128xf32>
    %8 = arith.addf %7, %0 : vector<8x128xf32>
    %c0_6 = arith.constant 0 : index
    %c0_7 = arith.constant 0 : index
    %9 = vector.load %arg4[%c0_6, %c0_7] : memref<8x128xf32, #tpu.memory_space<vmem>>, vector<8x128xf32>
    tpu.vector_store %arg4[%c0_6, %c0_7], %8 {strides = array<i32>} : memref<8x128xf32, #tpu.memory_space<vmem>>, vector<8x128xf32>,
    return
  }
  func.func @transform_0(%arg0: i32) -> (i32, i32) {
    %c0_i32 = arith.constant 0 : i32
    %c0_i32_0 = arith.constant 0 : i32
    return %arg0, %c0_i32 : i32, i32
  }
  func.func @transform_1(%arg0: i32) -> (i32, i32) {
    %c0_i32 = arith.constant 0 : i32
    %c0_i32_0 = arith.constant 0 : i32
    %c0_i32_1 = arith.constant 0 : i32
    return %c0_i32, %c0_i32_0 : i32, i32
  }
  func.func @transform_2(%arg0: i32) -> (i32, i32) {
    %c0_i32 = arith.constant 0 : i32
    %c0_i32_0 = arith.constant 0 : i32
    %c0_i32_1 = arith.constant 0 : i32
    return %c0_i32, %c0_i32_0 : i32, i32
  }
  func.func @transform_3(%arg0: i32) -> (i32, i32) {
    %c0_i32 = arith.constant 0 : i32
    %c0_i32_0 = arith.constant 0 : i32
    return %arg0, %c0_i32 : i32, i32
  }
}

</mosaic_0001>

<bundles_post_ra>
// kernel: tpu_custom_call.1
= control target key start
LH: loop header
LB: loop body
LE: loop exit
PB: predicated region body
PF: predicated region fallthrough
CT: control target
= control target key end

     0   :  { %8 = vsyncpa [#allocation3], 0  ;;  %s909_s0 = inlined_call_operand.hbm [shape: f32[16,128], index: 0, kind: input, shape index: {}]   ;;  %s910_s1 = inlined_call_operand.hbm [shape: f32[128,128], index: 1, kind: input, shape index: {}]   ;;  %s911_s2 = inlined_call_operand.vmem [shape: f32[1,128], index: 2, kind: input, shape index: {}]   ;;  %s912_s3 = inlined_call_operand.hbm [shape: f32[16,128], index: 3, kind: output, shape index: {}]  }
   0x1   :  { %10 = vsyncpa [#allocation3 + $0x1], 0 }
   0x2   :  { %11 = vsyncpa [#allocation6], 0 }
   0x3   :  { %12 = vsyncpa [#allocation4], 0 }
   0x4   :  { %14 = vsyncpa [#allocation4 + $0x1], 0  ;;  %s703_s12 = smov 0   ;;  %s705_s13 = smov 0  }
   0x5   :  { %s707_s14 = smov 0   ;;  %s709_s15 = smov 0  }
   0x6 LB: > { %s724_s16 = sadd.s32 4294967295, %s673_s15   ;;  %s392_s17 = sadd.s32 4294967294, %s673_s15   ;;  %s673_s15 = sphi %s709_s15, %s932_s15   ;;  %s669_s14 = sphi %s707_s14, %s931_s14   ;;  %s665_s13 = sphi %s705_s13, %s930_s13   ;;  %s661_s12 = sphi %s703_s12, %s929_s12  }
   0x7   : > { %p40_p0 = scmp.ne.s32.totalorder %s665_s13, %s661_s12  ;;  %p913_p1 = scmp.eq.s32.totalorder %s724_s16, 0 }
   0x8   : > { %p112_p3 = scmp.eq.s32.totalorder %s392_s17, 1  ;;  %p393_p5 = scmp.ge.s32.totalorder %s673_s15, 1 }
   0x9   : > { %p733_p4 = por %p913_p1, %p40_p0  ;;  %p119_p7 = scmp.lt.s32.totalorder %s673_s15, 3 }
   0xa   : > { %p738_p6 = por %p112_p3, %p40_p0  ;;  %s675_s21 = smov [#allocation5]  }
   0xb   : > { %s916_s18 = scalar_select %p733_p4, 1, 0 }
   0xc   : > { %s917_s19 = scalar_select %p738_p6, 1, 0 }
   0xd   : > { %p743_p8 = pnand %p393_p5, %p119_p7  ;;  %s131_s22 = sshll.u32 %s675_s21, 4  ;;  %s747_s22 = int_to_ptr.vmem [resolvable:$true] %s131_s22 }
   0xe   : > { %s759_s24 = sadd.s32 1, %s673_s15   ;;  %s27_s25 = sadd.s32 1, %s669_s14 }
   0xf   : > { %s918_s20 = scalar_select %p743_p8, 1, 0 }
  0x10   : > { %p491_p9 = pneg %p743_p8  ;;  %s24_s26 = ssub.s32 %s673_s15, %s759_s24 }
  0x11   : > { %s545_s29 = scalar_lea.hbm %s910_s1, 2048 }
  0x12   : > { %p754_p11 = pnand %p491_p9, %p913_p1  ;;  %p546_p12 = scmp.ne.s32.totalorder %s910_s1, %s545_s29 }
  0x13   : > { %p552_p5 = scmp.lt.u32.totalorder %s545_s29, %s910_s1 }
  0x14   : > { %p547_p13 = pneg %p754_p11 }
  0x16   : > { %p548_p0 = pnand %p547_p13, %p546_p12 }
  0x18   : > { %p549_p3 = pneg %p548_p0 }
  0x1a   : > { %p554_p7 = pnand %p552_p5, %p549_p3 }
  0x1c   : > { %557 = shalt.err (!%p554_p7)
}
  0x1d   : > { %s558_s7 = scalar_lea.vmem %s747_s22, 2048  ;;  %p566_p2 = scmp.lt.s32.totalorder %s747_s22, %s747_s22 }
  0x1e   : > { %p559_p9 = scmp.ne.s32.totalorder %s747_s22, %s558_s7  ;;  %p567_p6 = scmp.lt.s32.totalorder %s558_s7, %s558_s7 }
  0x20   : > { %p561_p10 = pnand %p559_p9, %p547_p13  ;;  %p568_p4 = por %p567_p6, %p566_p2 }
  0x22   : > { %p562_p1 = pneg %p561_p10 }
  0x24   : > { %p569_p8 = pnand %p568_p4, %p562_p1 }
  0x26   : > { %572 = shalt.err (!%p569_p8)
}
  0x27   : > { %s676_s8 = smov 128   ;;  %s677_s9 = smov 8  }
  0x28   : > { %494 = dma.hbm_to_vmem [thread:$0]  (!%p754_p11), %s910_s1, 2048, %s747_s22, [#allocation6], %s676_s8, %s676_s8, %s677_s9  }
  0x29   : > { %p25_p2 = scmp.eq.s32.totalorder %s24_s26, 0  ;;  %p34_p1 = scmp.ne.s32.totalorder %s669_s14, %s665_s13 }
  0x2a   : > { %p35_p4 = scmp.eq.s32.totalorder %s673_s15, 0  ;;  %p504_p6 = scmp.lt.s32.totalorder %s673_s15, 2 }
  0x2b   : > { %s790_s17 = scalar_select %p25_p2, %s669_s14, %s27_s25  }
  0x2c   : > { %p36_p8 = por %p35_p4, %p34_p1  ;;  %p920_p10 = scmp.eq.s32.totalorder %s724_s16, 1 }
  0x2d   : > { %s148_s27 = sand.u32 1, %s669_s14   ;;  %s397_s28 = sshll.u32 %s673_s15, 7 }
  0x2e   : > { %p794_p12 = por %p920_p10, %p34_p1  ;;  %s396_s29 = sshll.u32 %s148_s27, 3 }
  0x2f   : > { %s803_s4 = scalar_lea.hbm %s909_s0, %s397_s28  ;;  %s152_s22 = scalar_lea.vmem [#allocation2], %s396_s29 }
  0x30   : > { %s159_s25 = sshll.u32 %s152_s22, 4  ;;  %p805_p11 = pnand %p504_p6, %p36_p8  ;;  %s809_s25 = int_to_ptr.vmem [resolvable:$true] %s159_s25 }
  0x31   : > { %s149_s5 = scalar_lea.sflag [#allocation3], %s148_s27  ;;  %s573_s6 = scalar_lea.hbm %s803_s4, 128 }
  0x32   : > { %p574_p13 = scmp.ne.s32.totalorder %s803_s4, %s573_s6  ;;  %p575_p0 = pneg %p805_p11 }
  0x33   : > { %s578_s9 = scalar_lea.hbm %s909_s0, 256  ;;  %p579_p7 = scmp.lt.u32.totalorder %s803_s4, %s909_s0 }
  0x34   : > { %p576_p3 = pnand %p575_p0, %p574_p13  ;;  %p580_p9 = scmp.lt.u32.totalorder %s578_s9, %s573_s6 }
  0x35   : > { %p582_p1 = scmp.lt.u32.totalorder %s573_s6, %s803_s4 }
  0x36   : > { %p577_p5 = pneg %p576_p3  ;;  %p581_p2 = por %p580_p9, %p579_p7 }
  0x38   : > { %p583_p4 = por %p582_p1, %p581_p2 }
  0x3a   : > { %p584_p6 = pnand %p583_p4, %p577_p5 }
  0x3c   : > { %587 = shalt.err (!%p584_p6)
}
  0x3d   : > { %s588_s27 = scalar_lea.vmem %s809_s25, 128  ;;  %s678_s28 = smov [#allocation2]  }
  0x3e   : > { %p589_p8 = scmp.ne.s32.totalorder %s809_s25, %s588_s27  ;;  %s593_s29 = sshll.u32 %s678_s28, 4  ;;  %s594_s29 = int_to_ptr.vmem [resolvable:$false] %s593_s29 }
  0x3f   : > { %s595_s23 = scalar_lea.vmem %s594_s29, 256  ;;  %p596_p3 = scmp.lt.s32.totalorder %s809_s25, %s594_s29 }
  0x40   : > { %p591_p10 = pnand %p589_p8, %p575_p0  ;;  %p597_p7 = scmp.lt.s32.totalorder %s595_s23, %s588_s27 }
  0x42   : > { %p592_p13 = pneg %p591_p10  ;;  %p598_p9 = por %p597_p7, %p596_p3 }
  0x44   : > { %p599_p2 = pnand %p598_p9, %p592_p13 }
  0x46   : > { %602 = shalt.err (!%p599_p2)
}
  0x47   : > { %498 = dma.hbm_to_vmem [thread:$0]  (!%p805_p11), %s803_s4, 128, %s809_s25, %s149_s5  }
  0x48   : > { %p923_p5 = scmp.ne.s32.totalorder %s918_s20, 0 }
  0x49   : > { %s839_s30 = sand.u32 (!%p923_p5), 1, %s665_s13   ;;  %p924_p0 = scmp.ne.s32.totalorder (!%p923_p5), %s916_s18, 0 }
  0x4a   : > { %168 = sbr.rel (%p923_p5) target bundleno = 351 (0x15f), region = 32  ;;  %s399_s22 = sshll.u32 (!%p923_p5), %s839_s30, 3 }
  0x4b   : > { %s171_s6 = scalar_lea.sflag (!%p923_p5), [#allocation3], %s839_s30  ;;  %s845_s7 = scalar_lea.vmem (!%p923_p5), [#allocation2], %s399_s22 }
  0x51   : > { %648 = dma.done.wait (%p924_p0), %s171_s6, 128  }
  0x52   : > { %650 = vsyncadd (%p924_p0), %s171_s6, 4294967168  ;;  %p925_p11 = scmp.eq.s32.totalorder %s724_s16, 0 }
  0x54   : > { %652 = dma.done.wait (%p925_p11), [#allocation6], 2048   ;;  %p926_p1 = pmov %p925_p11 }
  0x55   : > { %v679_v0 = vmov 0.0|0.0   ;;  %vm680_vm0 = vmmov 0   ;;  %v681_v1 = vmov 0.0   ;;  %v202_v2 = vld [vmem:[#allocation5] sm:$0xff]  ;;  %v203_v3 = vld [vmem:[#allocation5 + $0x8] sm:$0xff]  ;;  %v204_v4 = vld [vmem:[#allocation5 + $0x10] sm:$0xff] }
  0x56   : > { %654 = vsyncadd (%p926_p1), [#allocation6], 4294965248  ;;  %459 = vmatprep.subr.bf16.mxu0 %v679_v0  ;;  %456 = vmatprep.mubr.msk.f32.mxu0 %vm680_vm0, %v681_v1  ;;  %v460_v5 = vpack.c.bf16 %v203_v3, %v202_v2  ;;  %v205_v6 = vld [vmem:[#allocation5 + $0x18] sm:$0xff]  ;;  %v206_v8 = vld [vmem:[#allocation5 + $0x20] sm:$0xff]  ;;  %s404_s4 = sshll.u32 %s724_s16, 7  ;;  %s200_s25 = scalar_lea.vmem [#allocation7], %s399_s22 }
  0x57   : > { %v463_v7 = vpack.c.bf16 %v205_v6, %v204_v4  ;;  %v207_v9 = vld [vmem:[#allocation5 + $0x28] sm:$0xff]  ;;  %v208_v11 = vld [vmem:[#allocation5 + $0x30] sm:$0xff]  ;;  %v209_v12 = vld [vmem:[#allocation5 + $0x38] sm:$0xff]  ;;  %s312_s26 = sshll.u32 %s200_s25, 4  ;;  %s865_s9 = scalar_lea.hbm %s912_s3, %s404_s4  ;;  %s867_s26 = int_to_ptr.vmem [resolvable:$true] %s312_s26 }
  0x58   : > { %461 = vmatpush3.bf16.msra.mxu0 %v460_v5  ;;  %v466_v10 = vpack.c.bf16 %v207_v9, %v206_v8  ;;  %v469_v13 = vpack.c.bf16 %v209_v12, %v208_v11  ;;  %v210_v14 = vld [vmem:[#allocation5 + $0x40] sm:$0xff]  ;;  %v211_v15 = vld [vmem:[#allocation5 + $0x48] sm:$0xff]  ;;  %v212_v17 = vld [vmem:[#allocation5 + $0x50] sm:$0xff]  ;;  %s299_s10 = scalar_lea.sflag [#allocation4], %s839_s30  ;;  %s603_s11 = scalar_lea.vmem %s867_s26, 128 }
  0x59   : > { %462 = vmatprep.subr.bf16.mxu0 %v679_v0  ;;  %v472_v16 = vpack.c.bf16 %v211_v15, %v210_v14  ;;  %v213_v18 = vld [vmem:[#allocation5 + $0x58] sm:$0xff]  ;;  %v214_v20 = vld [vmem:[#allocation5 + $0x60] sm:$0xff]  ;;  %v215_v21 = vld [vmem:[#allocation5 + $0x68] sm:$0xff]  ;;  %p604_p4 = scmp.ne.s32.totalorder %s867_s26, %s603_s11  ;;  %s682_s16 = smov [#allocation7]  }
  0x5a   : > { %v475_v19 = vpack.c.bf16 %v213_v18, %v212_v17  ;;  %v478_v22 = vpack.c.bf16 %v215_v21, %v214_v20  ;;  %v216_v23 = vld [vmem:[#allocation5 + $0x70] sm:$0xff]  ;;  %v217_v24 = vld [vmem:[#allocation5 + $0x78] sm:$0xff]  ;;  %s607_s27 = sshll.u32 %s682_s16, 4  ;;  %s608_s27 = int_to_ptr.vmem [resolvable:$false] %s607_s27 }
  0x5b   : > { %v481_v25 = vpack.c.bf16 %v217_v24, %v216_v23  ;;  %v201_v26 = vld [vmem:[%s845_s7] sm:$0xff]  ;;  %p605_p6 = pnand %p604_p4, %p794_p12  ;;  %s609_s28 = scalar_lea.vmem %s608_s27, 256 }
  0x5c   : > { %464 = vmatpush3.bf16.msra.mxu0 %v463_v7  ;;  %v402_v27 = vld [vmem:[%s911_s2] ss:$0 sm:$0xff]  ;;  %p610_p10 = scmp.lt.s32.totalorder %s867_s26, %s608_s27  ;;  %p611_p13 = scmp.lt.s32.totalorder %s609_s28, %s603_s11 }
  0x5d   : > { %465 = vmatprep.subr.bf16.mxu0 %v679_v0  ;;  %p606_p8 = pneg %p605_p6 }
  0x5e   : > { %p612_p3 = por %p611_p13, %p610_p10 }
  0x60   : > { %467 = vmatpush3.bf16.msra.mxu0 %v466_v10  ;;  %p613_p7 = pnand %p612_p3, %p606_p8 }
  0x61   : > { %468 = vmatprep.subr.bf16.mxu0 %v679_v0 }
  0x64   : > { %470 = vmatpush3.bf16.msra.mxu0 %v469_v13 }
  0x65   : > { %471 = vmatprep.subr.bf16.mxu0 %v679_v0 }
  0x68   : > { %473 = vmatpush3.bf16.msra.mxu0 %v472_v16 }
  0x69   : > { %474 = vmatprep.subr.bf16.mxu0 %v679_v0 }
  0x6c   : > { %476 = vmatpush3.bf16.msra.mxu0 %v475_v19 }
  0x6d   : > { %477 = vmatprep.subr.bf16.mxu0 %v679_v0 }
  0x70   : > { %479 = vmatpush3.bf16.msra.mxu0 %v478_v22 }
  0x71   : > { %480 = vmatprep.subr.bf16.mxu0 %v679_v0 }
  0x74   : > { %482 = vmatpush3.bf16.msra.mxu0 %v481_v25 }
  0x77   : > { %457 = vmatmul.mubr.f32.vlgmr.msra.gmra.mrb[0].mxu0 %v201_v26 }
 0x14a   : > { %v291_v28 = vpop.f32.mrb[0].mxu0 }
 0x14b   : > { %v292_v29 = vadd.f32 %v402_v27, %v291_v28  ;;  %v458_v30 = vpop.f32.mrb[1].mxu0 }
 0x14d   : > { %v295_v31 = vmax.f32 %v292_v29, 0.0 }
 0x14f   : > { %v296_v32 = vadd.f32 %v295_v31, %v201_v26 }
 0x151   : > { %297 = vst [vmem:[%s200_s25] sm:$0xff] %v296_v32 }
 0x152   : > { %616 = shalt.err (!%p613_p7)
}
 0x153   : > { %s617_s29 = scalar_lea.hbm %s865_s9, 128  ;;  %s621_s22 = scalar_lea.hbm %s912_s3, 256 }
 0x154   : > { %p618_p9 = scmp.ne.s32.totalorder %s865_s9, %s617_s29  ;;  %p622_p0 = scmp.lt.u32.totalorder %s865_s9, %s912_s3 }
 0x155   : > { %p623_p11 = scmp.lt.u32.totalorder %s621_s22, %s617_s29  ;;  %p625_p4 = scmp.lt.u32.totalorder %s617_s29, %s865_s9 }
 0x156   : > { %p619_p2 = pnand %p618_p9, %p794_p12 }
 0x157   : > { %p624_p1 = por %p623_p11, %p622_p0 }
 0x158   : > { %p620_p5 = pneg %p619_p2 }
 0x159   : > { %p626_p6 = por %p625_p4, %p624_p1 }
 0x15b   : > { %p627_p8 = pnand %p626_p6, %p620_p5 }
 0x15d   : > { %630 = shalt.err (!%p627_p8)
}
 0x15e   : > { %489 = dma.vmem_to_hbm [thread:$0]  (%p794_p12), %s867_s26, 128, %s865_s9, %s299_s10  }
 0x15f PF: > { %s324_s18 = sand.u32 1, %s661_s12   ;;  %p927_p10 = scmp.ne.s32.totalorder %s917_s19, 0 }
 0x160   : > { %p928_p13 = scmp.ge.s32.totalorder %s673_s15, 2  ;;  %s325_s20 = scalar_lea.sflag [#allocation4], %s324_s18 }
 0x162   : > { %p500_p3 = pnand %p928_p13, %p927_p10 }
 0x164   : > { %656 = dma.done.wait (!%p500_p3), %s325_s20, 128  }
 0x165   : > { %658 = vsyncadd (!%p500_p3), %s325_s20, 4294967168  ;;  %p17_p7 = scmp.ge.s32.totalorder %s759_s24, 4   ;;  %s929_s12 = smov %s665_s13 }
 0x166   : > { %s930_s13 = smov %s669_s14  ;;  %s931_s14 = smov %s790_s17 }
 0x167   : > { %s932_s15 = smov %s759_s24  ;;  %19 = sbr.rel (!%p17_p7) target bundleno = 6 (0x6), region = 81 }
 0x16e   :  { %330 = vsyncpa [#allocation3], 1 }
 0x16f   :  { %332 = vsyncpa [#allocation3 + $0x1], 1 }
 0x170   :  { %333 = vsyncpa [#allocation6], 1 }
 0x171   :  { %334 = vsyncpa [#allocation4], 1 }
 0x172   :  { %336 = vsyncpa [#allocation4 + $0x1], 1 }

</bundles_post_ra>
